<compile_context>
chip_gen: v5e
topology: v5e:2x2
jax: 0.10.0
libtpu: 0.0.40
codegen_flags: <defaults>
</compile_context>

<pallas_src>
import math
import functools

import jax
import jax.numpy as jnp
from jax.experimental import pallas as pl
from jax.experimental.pallas import tpu as pltpu


def _round_up(x, m):
    return (x + m - 1) // m * m


def _random_layer_kernel(*refs, num_inputs, scale):
    # refs = (x_0, w_0, x_1, w_1, ..., x_{N-1}, w_{N-1}, out)
    out_ref = refs[-1]
    x0 = refs[0][...]
    w0 = refs[1][...]
    # Cast activations to the weight compute dtype (bf16) in-register; accumulate f32.
    acc = jnp.dot(x0.astype(w0.dtype), w0, preferred_element_type=jnp.float32) * scale
    for i in range(1, num_inputs):
        xi = refs[2 * i][...]
        wi = refs[2 * i + 1][...]
        acc = acc * jnp.dot(xi.astype(wi.dtype), wi, preferred_element_type=jnp.float32)
    out_ref[...] = acc.astype(out_ref.dtype)


def random_layer_forward(
    input_list,
    random_matrices,
    *,
    weight_dtype=jnp.bfloat16,
    max_tile_b=256,
    vmem_budget_bytes=40 * 1024 * 1024,
):
    """Fused RandomLayer forward.

    input_list:      list of arrays [B, d_i]
    random_matrices: list of arrays [d_i, output_dim]
    returns:         [B, output_dim] float32
    """
    num_inputs = len(input_list)
    assert num_inputs == len(random_matrices) and num_inputs >= 1
    B = input_list[0].shape[0]
    output_dim = random_matrices[0].shape[1]
    d_list = [int(x.shape[1]) for x in input_list]
    for x, w in zip(input_list, random_matrices):
        assert x.shape[0] == B
        assert x.shape[1] == w.shape[0]
        assert w.shape[1] == output_dim

    scale = 1.0 / math.pow(float(output_dim), 1.0 / num_inputs)

    w_itemsize = jnp.dtype(weight_dtype).itemsize
    x_bytes_per_row = sum(d_list) * 4            # f32 activations
    w_bytes_per_col = sum(d_list) * w_itemsize   # bf16 weights

    # --- tile selection -------------------------------------------------
    n_pad = _round_up(output_dim, 128)
    b_pad = _round_up(B, 8)

    def vmem_needed(tb, tn):
        # double-buffered activations + output, weights counted x2 for safety.
        return (2 * tb * x_bytes_per_row
                + 2 * tn * w_bytes_per_col
                + 2 * tb * tn * 4)

    tile_b = min(_round_up(max_tile_b, 8), b_pad)
    tile_n = n_pad  # prefer fully VMEM-resident weights
    while vmem_needed(tile_b, tile_n) > vmem_budget_bytes and tile_n > 128:
        tile_n = max(128, _round_up(tile_n // 2, 128))
    while vmem_needed(tile_b, tile_n) > vmem_budget_bytes and tile_b > 8:
        tile_b = max(8, _round_up(tile_b // 2, 8))

    # Re-pad so tiles divide the padded extents (extra zero rows/cols, sliced off).
    b_pad = _round_up(b_pad, tile_b)
    n_pad = _round_up(n_pad, tile_n)

    # --- host-side prep: pad + cast weights once ------------------------
    args = []
    in_specs = []
    for x, w, d_i in zip(input_list, random_matrices, d_list):
        x = x.astype(jnp.float32)
        if b_pad != B:
            x = jnp.pad(x, ((0, b_pad - B), (0, 0)))
        w = w.astype(weight_dtype)
        if n_pad != output_dim:
            w = jnp.pad(w, ((0, 0), (0, n_pad - output_dim)))
        args.extend([x, w])
        # x_i tile: (tile_b, d_i) — full contraction dim (d_i is small).
        in_specs.append(pl.BlockSpec((tile_b, d_i), lambda jn, ib: (ib, 0)))
        # W_i tile: (d_i, tile_n) — constant along the batch axis, so it is
        # DMA'd only when the output tile changes (once per sweep / once total).
        in_specs.append(pl.BlockSpec((d_i, tile_n), lambda jn, ib: (0, jn)))

    out_spec = pl.BlockSpec((tile_b, tile_n), lambda jn, ib: (ib, jn))

    # Weight axis outermost, batch axis innermost -> weights revisited in VMEM.
    grid = (n_pad // tile_n, b_pad // tile_b)

    vmem_limit = int(min(vmem_needed(tile_b, tile_n) + 8 * 1024 * 1024,
                         56 * 1024 * 1024))
    vmem_limit = max(vmem_limit, 16 * 1024 * 1024)

    kernel = functools.partial(
        _random_layer_kernel, num_inputs=num_inputs, scale=scale
    )

    out_padded = pl.pallas_call(
        kernel,
        out_shape=jax.ShapeDtypeStruct((b_pad, n_pad), jnp.float32),
        grid_spec=pltpu.PrefetchScalarGridSpec(
            num_scalar_prefetch=0,
            grid=grid,
            in_specs=in_specs,
            out_specs=out_spec,
        ),
        compiler_params=pltpu.CompilerParams(
            dimension_semantics=("parallel", "parallel"),
            vmem_limit_bytes=vmem_limit,
        ),
    )(*args)

    return out_padded[:B, :output_dim]


def random_layer_reference(input_list, random_matrices, weight_dtype=jnp.bfloat16):
    """Pure-JAX reference with the same dtype handling as the kernel."""
    num = len(input_list)
    output_dim = random_matrices[0].shape[1]
    xs = [x.astype(jnp.float32).astype(weight_dtype).astype(jnp.float32)
          for x in input_list]
    ws = [w.astype(weight_dtype).astype(jnp.float32) for w in random_matrices]
    projs = [x @ w for x, w in zip(xs, ws)]
    out = projs[0] / math.pow(float(output_dim), 1.0 / num)
    for p in projs[1:]:
        out = out * p
    return out


if __name__ == "__main__":
    key = jax.random.PRNGKey(0)

    # Small shapes consistent with CDAN usage: two inputs (features, softmax).
    B = 32
    input_dim_list = [64, 16]
    output_dim = 256  # lane-dense output (multiple of 128)

    keys = jax.random.split(key, 2 * len(input_dim_list))
    # Deterministic "random_matrix" parameters (torch.randn equivalent).
    random_matrices = [
        jax.random.normal(keys[i], (input_dim_list[i], output_dim), jnp.float32)
        for i in range(len(input_dim_list))
    ]
    # Example inputs.
    input_list = [
        jax.random.normal(
            keys[len(input_dim_list) + i], (B, input_dim_list[i]), jnp.float32
        )
        for i in range(len(input_dim_list))
    ]

    out = random_layer_forward(input_list, random_matrices)
    out = jax.block_until_ready(out)

    ref = random_layer_reference(input_list, random_matrices)
    assert out.shape == (B, output_dim)
    assert jnp.allclose(out, ref, rtol=1e-4, atol=1e-4), "mismatch vs reference"

    print("KERNEL_OK")
</pallas_src>

<mosaic_0001>
module attributes {stable_mosaic.version = 11 : i64} {
  func.func @_random_layer_kernel(%arg0: i32, %arg1: i32, %arg2: memref<32x64xf32, #tpu.memory_space<vmem>>, %arg3: memref<64x256xbf16, #tpu.memory_space<vmem>>, %arg4: memref<32x16xf32, #tpu.memory_space<vmem>>, %arg5: memref<16x256xbf16, #tpu.memory_space<vmem>>, %arg6: memref<32x256xf32, #tpu.memory_space<vmem>>) attributes {dimension_semantics = [#tpu.dimension_semantics<parallel>, #tpu.dimension_semantics<parallel>], iteration_bounds = array<i64: 1, 1>, scalar_prefetch = 0 : i64, scratch_operands = 0 : i64, tpu.core_type = #tpu.core_type<tc>, window_params = [{transform_indices = @transform_0, window_bounds = array<i64: 32, 64>}, {transform_indices = @transform_1, window_bounds = array<i64: 64, 256>}, {transform_indices = @transform_2, window_bounds = array<i64: 32, 16>}, {transform_indices = @transform_3, window_bounds = array<i64: 16, 256>}, {transform_indices = @transform_4, window_bounds = array<i64: 32, 256>}]} {
    %c0 = arith.constant 0 : index
    %c0_0 = arith.constant 0 : index
    %0 = vector.load %arg2[%c0, %c0_0] : memref<32x64xf32, #tpu.memory_space<vmem>>, vector<32x64xf32>
    %c0_1 = arith.constant 0 : index
    %c0_2 = arith.constant 0 : index
    %1 = vector.load %arg3[%c0_1, %c0_2] : memref<64x256xbf16, #tpu.memory_space<vmem>>, vector<64x256xbf16>
    %2 = arith.truncf %0 : vector<32x64xf32> to vector<32x64xbf16>
    %cst = arith.constant dense<0.000000e+00> : vector<32x256xf32>
    %3 = tpu.matmul %2, %1, %cst {dimension_numbers = #tpu.dot_dimension_numbers<[1], [0], [0], [1], [0, 0, 1, 1], [], []>} : vector<32x64xbf16>, vector<64x256xbf16>, vector<32x256xf32> -> vector<32x256xf32>
    %cst_3 = arith.constant 6.250000e-02 : f32
    %4 = vector.broadcast %cst_3 : f32 to vector<32x256xf32>
    %5 = arith.mulf %3, %4 : vector<32x256xf32>
    %c0_4 = arith.constant 0 : index
    %c0_5 = arith.constant 0 : index
    %6 = vector.load %arg4[%c0_4, %c0_5] : memref<32x16xf32, #tpu.memory_space<vmem>>, vector<32x16xf32>
    %c0_6 = arith.constant 0 : index
    %c0_7 = arith.constant 0 : index
    %7 = vector.load %arg5[%c0_6, %c0_7] : memref<16x256xbf16, #tpu.memory_space<vmem>>, vector<16x256xbf16>
    %8 = arith.truncf %6 : vector<32x16xf32> to vector<32x16xbf16>
    %cst_8 = arith.constant dense<0.000000e+00> : vector<32x256xf32>
    %9 = tpu.matmul %8, %7, %cst_8 {dimension_numbers = #tpu.dot_dimension_numbers<[1], [0], [0], [1], [0, 0, 1, 1], [], []>} : vector<32x16xbf16>, vector<16x256xbf16>, vector<32x256xf32> -> vector<32x256xf32>
    %10 = arith.mulf %5, %9 : vector<32x256xf32>
    %c0_9 = arith.constant 0 : index
    %c0_10 = arith.constant 0 : index
    %11 = vector.load %arg6[%c0_9, %c0_10] : memref<32x256xf32, #tpu.memory_space<vmem>>, vector<32x256xf32>
    tpu.vector_store %arg6[%c0_9, %c0_10], %10 {strides = array<i32>} : memref<32x256xf32, #tpu.memory_space<vmem>>, vector<32x256xf32>,
    return
  }
  func.func @transform_0(%arg0: i32, %arg1: i32) -> (i32, i32) {
    %c0_i32 = arith.constant 0 : i32
    %c0_i32_0 = arith.constant 0 : i32
    return %arg1, %c0_i32 : i32, i32
  }
  func.func @transform_1(%arg0: i32, %arg1: i32) -> (i32, i32) {
    %c0_i32 = arith.constant 0 : i32
    %c0_i32_0 = arith.constant 0 : i32
    return %c0_i32, %arg0 : i32, i32
  }
  func.func @transform_2(%arg0: i32, %arg1: i32) -> (i32, i32) {
    %c0_i32 = arith.constant 0 : i32
    %c0_i32_0 = arith.constant 0 : i32
    return %arg1, %c0_i32 : i32, i32
  }
  func.func @transform_3(%arg0: i32, %arg1: i32) -> (i32, i32) {
    %c0_i32 = arith.constant 0 : i32
    %c0_i32_0 = arith.constant 0 : i32
    return %c0_i32, %arg0 : i32, i32
  }
  func.func @transform_4(%arg0: i32, %arg1: i32) -> (i32, i32) {
    %c0_i32 = arith.constant 0 : i32
    return %arg1, %arg0 : i32, i32
  }
}

</mosaic_0001>

<bundles_post_ra>
// kernel: tpu_custom_call.1
= control target key start
LH: loop header
LB: loop body
LE: loop exit
PB: predicated region body
PF: predicated region fallthrough
CT: control target
= control target key end

     0   :  { %9 = vsyncpa [#allocation3], 0  ;;  %s433_s0 = inlined_call_operand.vmem [shape: f32[32,64], index: 0, kind: input, shape index: {}]   ;;  %s434_s1 = inlined_call_operand.hbm [shape: bf16[64,256], index: 1, kind: input, shape index: {}]   ;;  %s435_s2 = inlined_call_operand.vmem [shape: f32[32,16], index: 2, kind: input, shape index: {}]   ;;  %s436_s3 = inlined_call_operand.vmem [shape: bf16[16,256], index: 3, kind: input, shape index: {}]   ;;  %s437_s4 = inlined_call_operand.hbm [shape: f32[32,256], index: 4, kind: output, shape index: {}]  }
   0x1   :  { %10 = vsyncpa [#allocation4], 0  ;;  %s17_s17 = sshll.u32 %s434_s1, 4  ;;  %s356_s18 = smov [#allocation2]   ;;  %s18_s17 = int_to_ptr.hbm [resolvable:$true] %s17_s17 }
   0x2   :  { %s19_s19 = sshll.u32 %s356_s18, 4  ;;  %s357_s20 = smov 128   ;;  %s20_s19 = int_to_ptr.vmem [resolvable:$true] %s19_s19 }
   0x3   :  { %s358_s21 = smov 8  }
   0x4   :  { %25 = dma.hbm_to_vmem [thread:$0]  %s18_s17, 1024, %s20_s19, [#allocation3], %s357_s20, %s357_s20, %s358_s21  }
   0x5   :  { %352 = dma.done.wait [#allocation3], 1024  }
   0x6   :  { %353 = vsyncadd [#allocation3], 4294966272  ;;  %v266_v0 = vld [vmem:[#allocation2 + $0x30] sm:$0xf]  ;;  %v295_v1 = vld [vmem:[#allocation2 + $0x34] sm:$0xf0] }
   0x7   :  { %v294_v2 = vld [vmem:[#allocation2 + $0x34] sm:$0xf]  ;;  %v267_v3 = vor.u32 %v295_v1, %v266_v0  ;;  %v268_v4 = vld [vmem:[#allocation2 + $0x38] sm:$0xf0]  ;;  %v278_v5 = vld [vmem:[%s436_s3] sm:$0xf] }
   0x8   :  { %v297_v6 = vld [vmem:[%s436_s3 + $0x4] sm:$0xf0]  ;;  %v271_v7 = vor.u32 %v294_v2, %v268_v4  ;;  %v296_v9 = vld [vmem:[%s436_s3 + $0x4] sm:$0xf]  ;;  %v280_v10 = vld [vmem:[%s436_s3 + $0x8] sm:$0xf0] }
   0x9   :  { %v279_v8 = vor.u32 %v297_v6, %v278_v5  ;;  %v142_v11 = vld [vmem:[%s435_s2] sm:$0xff]  ;;  %100 = vmatpush.bf16.msra.mxu0 %v267_v3  ;;  %v283_v12 = vor.u32 %v296_v9, %v280_v10  ;;  %v143_v13 = vld [vmem:[%s435_s2 + $0x8] sm:$0xff]  ;;  %vm160_vm0 = vcmask 130048   ;;  %v250_v20 = vld [vmem:[#allocation2 + $0x10] sm:$0xf]  ;;  %vm89_vm1 = vcmask 523264  }
   0xa   :  { %v258_v14 = vld [vmem:[#allocation2 + $0x20] sm:$0xf]  ;;  %v293_v15 = vld [vmem:[#allocation2 + $0x24] sm:$0xf0]  ;;  %119 = vmatpush.bf16.msra.mxu1 %v271_v7  ;;  %v148_v16 = vpack.c.bf16 %v143_v13, %v142_v11  ;;  %v292_v18 = vld [vmem:[#allocation2 + $0x24] sm:$0xf] }
   0xb   :  { %174 = vmatpush.bf16.msra.mxu2 %v279_v8  ;;  %v259_v17 = vor.u32 %v293_v15, %v258_v14  ;;  %v260_v19 = vld [vmem:[#allocation2 + $0x28] sm:$0xf0]  ;;  %193 = vmatpush.bf16.msra.mxu3 %v283_v12  ;;  %v291_v22 = vld [vmem:[#allocation2 + $0x14] sm:$0xf0]  ;;  %v290_v23 = vld [vmem:[#allocation2 + $0x14] sm:$0xf] }
   0xc   :  { %v263_v21 = vor.u32 %v292_v18, %v260_v19  ;;  %v252_v24 = vld [vmem:[#allocation2 + $0x18] sm:$0xf0]  ;;  %v251_v25 = vor.u32 %v291_v22, %v250_v20  ;;  %v242_v27 = vld [vmem:[#allocation2] sm:$0xf]  ;;  %v289_v28 = vld [vmem:[#allocation2 + $0x4] sm:$0xf0] }
   0xd   :  { %101 = vmatpush.bf16.msra.mxu0 %v259_v17  ;;  %v255_v26 = vor.u32 %v290_v23, %v252_v24  ;;  %v288_v29 = vld [vmem:[#allocation2 + $0x4] sm:$0xf]  ;;  %v244_v30 = vld [vmem:[#allocation2 + $0x8] sm:$0xf0]  ;;  %v243_v31 = vor.u32 %v289_v28, %v242_v27  ;;  %v144_v36 = vld [vmem:[%s435_s2 + $0x10] sm:$0xff]  ;;  %s227_s20 = sshll.u32 %s437_s4, 4  ;;  %s228_s20 = int_to_ptr.hbm [resolvable:$true] %s227_s20 }
   0xe   :  { %284 = vmatmul.msk.bf16.vlgmr.msra.gmra.mxu2 %vm160_vm0, %v148_v16  ;;  %286 = vmatmul.msk.bf16.vlgmr.msra.gmra.mxu3 %vm160_vm0, %v148_v16  ;;  %v35_v32 = vld [vmem:[%s433_s0] sm:$0xff]  ;;  %v36_v33 = vld [vmem:[%s433_s0 + $0x8] sm:$0xff]  ;;  %v247_v34 = vor.u32 %v288_v29, %v244_v30  ;;  %v145_v37 = vld [vmem:[%s435_s2 + $0x18] sm:$0xff]  ;;  %s360_s21 = smov 256   ;;  %s361_s22 = smov 16  }
   0xf   :  { %120 = vmatpush.bf16.msra.mxu1 %v263_v21  ;;  %v47_v35 = vpack.c.bf16 %v36_v33, %v35_v32  ;;  %v149_v38 = vpack.c.bf16 %v145_v37, %v144_v36  ;;  %v37_v39 = vld [vmem:[%s433_s0 + $0x10] sm:$0xff]  ;;  %v38_v40 = vld [vmem:[%s433_s0 + $0x18] sm:$0xff]  ;;  %s359_s0 = smov [#allocation5]  }
  0x10   :  { %v48_v41 = vpack.c.bf16 %v38_v40, %v37_v39  ;;  %s225_s2 = sshll.u32 %s359_s0, 4  ;;  %s226_s2 = int_to_ptr.vmem [resolvable:$true] %s225_s2 }
  0x11   :  { %102 = vmatpush.bf16.msra.mxu0 %v251_v25 }
  0x13   :  { %121 = vmatpush.bf16.msra.mxu1 %v255_v26 }
  0x15   :  { %103 = vmatpush.bf16.msra.mxu0 %v243_v31 }
  0x17   :  { %122 = vmatpush.bf16.msra.mxu1 %v247_v34 }
  0x18   :  { %272 = vmatmul.msk.bf16.vlgmr.msra.gmra.mxu0 %vm89_vm1, %v47_v35 }
  0x1a   :  { %274 = vmatmul.msk.bf16.vlgmr.msra.gmra.mxu1 %vm89_vm1, %v47_v35 }
  0x1e   :  { %285 = vmatmul.msk.bf16.gmra.mxu2 %vm160_vm0, %v149_v38  ;;  %287 = vmatmul.msk.bf16.gmra.mxu3 %vm160_vm0, %v149_v38 }
  0x28   :  { %273 = vmatmul.msk.bf16.gmra.mxu0 %vm89_vm1, %v48_v41 }
  0x2a   :  { %275 = vmatmul.msk.bf16.gmra.mxu1 %vm89_vm1, %v48_v41 }
  0x91   :  { %v176_v42 = vpop.f32.mrf.mxu2  ;;  %v195_v43 = vpop.f32.mrf.mxu3 }
  0x95   :  { %v105_v44 = vpop.f32.mrf.mxu0 }
  0x96   :  { %v134_v45 = vmul.f32 0.0625, %v105_v44 }
  0x97   :  { %v124_v46 = vpop.f32.mrf.mxu1 }
  0x98   :  { %v135_v47 = vmul.f32 0.0625, %v124_v46  ;;  %v205_v48 = vmul.f32 %v176_v42, %v134_v45 }
  0x99   :  { %v178_v50 = vpop.f32.mrf.mxu2  ;;  %v197_v51 = vpop.f32.mrf.mxu3 }
  0x9a   :  { %v206_v49 = vmul.f32 %v195_v43, %v135_v47  ;;  %213 = vst [vmem:[#allocation5] sm:$0xff] %v205_v48 }
  0x9c   :  { %214 = vst [vmem:[#allocation5 + $0x8] sm:$0xff] %v206_v49 }
  0x9d   :  { %v107_v52 = vpop.f32.mrf.mxu0 }
  0x9e   :  { %v136_v53 = vmul.f32 0.0625, %v107_v52 }
  0x9f   :  { %v126_v54 = vpop.f32.mrf.mxu1 }
  0xa0   :  { %v137_v55 = vmul.f32 0.0625, %v126_v54  ;;  %v207_v56 = vmul.f32 %v178_v50, %v136_v53 }
  0xa1   :  { %v181_v58 = vpop.f32.mrf.mxu2  ;;  %v200_v60 = vpop.f32.mrf.mxu3 }
  0xa2   :  { %v208_v57 = vmul.f32 %v197_v51, %v137_v55  ;;  %215 = vst [vmem:[#allocation5 + $0x10] sm:$0xff] %v207_v56 }
  0xa4   :  { %216 = vst [vmem:[#allocation5 + $0x18] sm:$0xff] %v208_v57 }
  0xa5   :  { %v110_v59 = vpop.f32.mrf.mxu0 }
  0xa6   :  { %v138_v61 = vmul.f32 0.0625, %v110_v59 }
  0xa7   :  { %v129_v62 = vpop.f32.mrf.mxu1 }
  0xa8   :  { %v139_v63 = vmul.f32 0.0625, %v129_v62  ;;  %v209_v0 = vmul.f32 %v181_v58, %v138_v61 }
  0xa9   :  { %v183_v5 = vpop.f32.mrf.mxu2  ;;  %v202_v7 = vpop.f32.mrf.mxu3 }
  0xaa   :  { %v210_v1 = vmul.f32 %v200_v60, %v139_v63  ;;  %217 = vst [vmem:[#allocation5 + $0x20] sm:$0xff] %v209_v0 }
  0xac   :  { %218 = vst [vmem:[#allocation5 + $0x28] sm:$0xff] %v210_v1 }
  0xad   :  { %v112_v2 = vpop.f32.mrf.mxu0 }
  0xae   :  { %v140_v3 = vmul.f32 0.0625, %v112_v2 }
  0xaf   :  { %v131_v4 = vpop.f32.mrf.mxu1 }
  0xb0   :  { %v141_v6 = vmul.f32 0.0625, %v131_v4  ;;  %v211_v8 = vmul.f32 %v183_v5, %v140_v3 }
  0xb2   :  { %v212_v9 = vmul.f32 %v202_v7, %v141_v6  ;;  %219 = vst [vmem:[#allocation5 + $0x30] sm:$0xff] %v211_v8 }
  0xb4   :  { %220 = vst [vmem:[#allocation5 + $0x38] sm:$0xff] %v212_v9 }
  0xb5   :  { %233 = dma.vmem_to_hbm [thread:$0]  %s226_s2, 1024, %s228_s20, [#allocation4], %s360_s21, %s360_s21, %s361_s22  }
  0xb6   :  { %354 = dma.done.wait [#allocation4], 1024  }
  0xb7   :  { %355 = vsyncadd [#allocation4], 4294966272 }
  0xb8   :  { %238 = vsyncpa [#allocation3], 1 }
  0xb9   :  { %239 = vsyncpa [#allocation4], 1 }

</bundles_post_ra>
